<compile_context>
chip_gen: v7x
topology: tpu7x:2x2x1
jax: 0.10.0
libtpu: 0.0.40
codegen_flags: <defaults>
</compile_context>

<pallas_src>
import jax
import jax.numpy as jnp
import numpy as np
from jax.experimental import pallas as pl
from jax.experimental.pallas import tpu as pltpu

EPS = 1e-5  # nn.BatchNorm2d default eps

# static column slots inside the packed (8, 128) parameter slab
_COL_W1C0, _COL_W1C1, _COL_B1, _COL_G1, _COL_BT1, _COL_W2 = 0, 1, 2, 3, 4, 5
_COL_B2, _COL_G2, _COL_BT2 = 6, 7, 8


def prediction_kernel(x_ref, cp_ref, lw_ref, lb_ref, out_ref):
    x = x_ref[...]            # (2, S) f32 input state (channels x H*W)
    cp = cp_ref[...]          # (8, 128) packed small parameters
    a = lw_ref.shape[0] - 1   # action-space size

    w1c0 = cp[:, _COL_W1C0:_COL_W1C0 + 1]        # (8, 1)
    w1c1 = cp[:, _COL_W1C1:_COL_W1C1 + 1]
    b1 = cp[:, _COL_B1:_COL_B1 + 1]
    g1 = cp[:, _COL_G1:_COL_G1 + 1]
    bt1 = cp[:, _COL_BT1:_COL_BT1 + 1]
    w2 = cp[:, _COL_W2:_COL_W2 + 1]
    b2 = cp[0:2, _COL_B2:_COL_B2 + 1]            # (2, 1): [policy, value]
    g2 = cp[0:2, _COL_G2:_COL_G2 + 1]
    bt2 = cp[0:2, _COL_BT2:_COL_BT2 + 1]

    def batchnorm(h, gamma, beta):
        # training-mode BN: per-channel batch stats over the flattened N*H*W,
        # folded into a per-channel scale/shift (one rsqrt per channel on EUP).
        mu = jnp.mean(h, axis=1, keepdims=True)
        var = jnp.mean((h - mu) * (h - mu), axis=1, keepdims=True)  # biased var
        scale = gamma * jax.lax.rsqrt(var + EPS)
        return h * scale + (beta - mu * scale)

    # ---- fused first 1x1 conv + BN: rows 0-3 policy, rows 4-7 value ----
    h1 = w1c0 * x[0:1, :] + w1c1 * x[1:2, :] + b1            # (8, S)
    h1 = batchnorm(h1, g1, bt1)
    # ReLU only on the policy rows (the value head has no ReLU in the spec)
    row = jax.lax.broadcasted_iota(jnp.int32, h1.shape, 0)
    h1 = jnp.where(row < 4, jnp.maximum(h1, 0.0), h1)

    # ---- fused second 1x1 conv (block-diagonal 8 -> 2) + BN ----
    hw = h1 * w2                                             # (8, S)
    p2 = jnp.sum(hw[0:4, :], axis=0, keepdims=True)          # (1, S) policy
    v2 = jnp.sum(hw[4:8, :], axis=0, keepdims=True)          # (1, S) value
    act = jnp.concatenate([p2, v2], axis=0) + b2             # (2, S)
    act = batchnorm(act, g2, bt2)

    # ---- fused final Linear: lane-dense (A+1, S) weights, contract over S ----
    pre = jax.lax.dot_general(
        act, lw_ref[...],
        dimension_numbers=(((1,), (1,)), ((), ())),
        preferred_element_type=jnp.float32) + lb_ref[...]     # (2, A+1)

    logits = pre[0:1, 0:a]                                    # policy row
    m = jnp.max(logits, axis=-1, keepdims=True)
    e = jnp.exp(logits - m)
    probs = e / jnp.sum(e, axis=-1, keepdims=True)            # softmax
    value = jnp.tanh(pre[1:2, a:a + 1])                       # value row

    out_ref[...] = jnp.concatenate([probs, value], axis=1)    # (1, A+1)


def pack_params(params):
    """Pack the 20 tiny parameter tensors into 3 kernel inputs (done once)."""
    f32 = jnp.float32
    flat = lambda v: jnp.asarray(v, f32).reshape(-1)

    # 8-row fused-channel columns (rows 0-3 policy, rows 4-7 value)
    w1c0 = jnp.concatenate([flat(params["p_w1"][:, 0]), flat(params["v_w1"][:, 0])])
    w1c1 = jnp.concatenate([flat(params["p_w1"][:, 1]), flat(params["v_w1"][:, 1])])
    b1 = jnp.concatenate([flat(params["p_b1"]), flat(params["v_b1"])])
    g1 = jnp.concatenate([flat(params["p_g1"]), flat(params["v_g1"])])
    bt1 = jnp.concatenate([flat(params["p_bt1"]), flat(params["v_bt1"])])
    w2 = jnp.concatenate([flat(params["p_w2"]), flat(params["v_w2"])])
    cols8 = jnp.stack([w1c0, w1c1, b1, g1, bt1, w2], axis=1)          # (8, 6)

    # 2-row columns for the second conv's bias / BN params (row 0 policy, 1 value)
    b2 = jnp.concatenate([flat(params["p_b2"]), flat(params["v_b2"])])
    g2 = jnp.concatenate([flat(params["p_g2"]), flat(params["v_g2"])])
    bt2 = jnp.concatenate([flat(params["p_bt2"]), flat(params["v_bt2"])])
    cols2 = jnp.pad(jnp.stack([b2, g2, bt2], axis=1), ((0, 6), (0, 0)))  # (8, 3)

    slab = jnp.concatenate([cols8, cols2], axis=1)                    # (8, 9)
    slab = jnp.pad(slab, ((0, 0), (0, 128 - slab.shape[1])))          # (8, 128)

    # lane-dense (A+1, S) stacked linear weights; last row = value head
    lw = jnp.concatenate([jnp.asarray(params["p_lw"], f32).T,
                          jnp.asarray(params["v_lw"], f32).T], axis=0)
    lb = jnp.concatenate([jnp.asarray(params["p_lb"], f32).reshape(1, -1),
                          jnp.asarray(params["v_lb"], f32).reshape(1, 1)], axis=1)
    return dict(slab=slab, lw=lw, lb=lb)


@jax.jit
def prediction_function(state, packed):
    """state: NCHW (1, 2, H, W).  packed: output of pack_params.
    Returns (p: (A,), v: (1,))."""
    n, c, h, w = state.shape
    assert n == 1 and c == 2
    x2d = state.reshape(c, h * w).astype(jnp.float32)
    a = packed["lw"].shape[0] - 1

    vmem = pl.BlockSpec(memory_space=pltpu.MemorySpace.VMEM)
    out = pl.pallas_call(
        prediction_kernel,
        out_shape=jax.ShapeDtypeStruct((1, a + 1), jnp.float32),
        in_specs=[vmem, vmem, vmem, vmem],
        out_specs=vmem,
    )(x2d, packed["slab"], packed["lw"], packed["lb"])
    return out[0, :a], out[0, a:a + 1]


def init_params(key, env_size, action_space):
    """Deterministic synthetic parameters with the shapes implied by __init__."""
    ks = iter(jax.random.split(key, 20))

    def nrm(shape, scale=0.1):
        return (scale * jax.random.normal(next(ks), shape)).astype(jnp.float32)

    def bn(c):
        return 1.0 + nrm((c, 1)), nrm((c, 1))   # gamma, beta (perturbed defaults)

    p_g1, p_bt1 = bn(4)
    p_g2, p_bt2 = bn(1)
    v_g1, v_bt1 = bn(4)
    v_g2, v_bt2 = bn(1)
    return dict(
        # policy branch: Conv2d(2->4,1), Conv2d(4->1,1), Linear(env_size, A)
        p_w1=nrm((4, 2)), p_b1=nrm((4, 1)), p_g1=p_g1, p_bt1=p_bt1,
        p_w2=nrm((1, 4)), p_b2=nrm((1, 1)), p_g2=p_g2, p_bt2=p_bt2,
        p_lw=nrm((env_size, action_space)), p_lb=nrm((1, action_space)),
        # value branch: Conv2d(2->4,1), Conv2d(4->1,1), Linear(env_size, 1)
        v_w1=nrm((4, 2)), v_b1=nrm((4, 1)), v_g1=v_g1, v_bt1=v_bt1,
        v_w2=nrm((1, 4)), v_b2=nrm((1, 1)), v_g2=v_g2, v_bt2=v_bt2,
        v_lw=nrm((env_size, 1)), v_lb=nrm((1, 1)),
    )


def reference(state, params):
    """Pure-JAX reference mirroring the PyTorch forward pass."""
    x = state.reshape(2, -1).astype(jnp.float32)

    def conv_bn(inp, w, b, g, bt):
        h = w @ inp + b
        mu = h.mean(axis=1, keepdims=True)
        var = ((h - mu) ** 2).mean(axis=1, keepdims=True)
        return (h - mu) / jnp.sqrt(var + EPS) * g + bt

    p = jax.nn.relu(conv_bn(x, params["p_w1"], params["p_b1"],
                            params["p_g1"], params["p_bt1"]))
    p = conv_bn(p, params["p_w2"], params["p_b2"],
                params["p_g2"], params["p_bt2"])
    logits = p.reshape(-1) @ params["p_lw"] + params["p_lb"].reshape(-1)
    p_out = jax.nn.softmax(logits, axis=0)

    v = conv_bn(x, params["v_w1"], params["v_b1"],
                params["v_g1"], params["v_bt1"])
    v = conv_bn(v, params["v_w2"], params["v_b2"],
                params["v_g2"], params["v_bt2"])
    v_out = jnp.tanh(v.reshape(-1) @ params["v_lw"] + params["v_lb"].reshape(-1))
    return p_out, v_out


if __name__ == "__main__":
    key = jax.random.PRNGKey(0)
    k_state, k_params = jax.random.split(key)

    N, C, H, W = 1, 2, 16, 16        # environment_size() = H*W = 256
    ACTION_SPACE = 8

    state = jax.random.normal(k_state, (N, C, H, W), dtype=jnp.float32)
    params = init_params(k_params, H * W, ACTION_SPACE)
    packed = pack_params(params)

    p, v = prediction_function(state, packed)
    jax.block_until_ready((p, v))

    p_ref, v_ref = reference(state, params)
    assert p.shape == (ACTION_SPACE,) and v.shape == (1,)
    np.testing.assert_allclose(np.asarray(p), np.asarray(p_ref), rtol=5e-4, atol=1e-5)
    np.testing.assert_allclose(np.asarray(v), np.asarray(v_ref), rtol=5e-4, atol=1e-5)

    print("KERNEL_OK")
</pallas_src>

<mosaic_0001>
module attributes {stable_mosaic.version = 11 : i64} {
  func.func @prediction_kernel(%arg0: memref<2x256xf32, #tpu.memory_space<vmem>>, %arg1: memref<8x128xf32, #tpu.memory_space<vmem>>, %arg2: memref<9x256xf32, #tpu.memory_space<vmem>>, %arg3: memref<1x9xf32, #tpu.memory_space<vmem>>, %arg4: memref<1x9xf32, #tpu.memory_space<vmem>>) attributes {dimension_semantics = [], scalar_prefetch = 0 : i64, scratch_operands = 0 : i64, tpu.core_type = #tpu.core_type<tc>} {
    %c0 = arith.constant 0 : index
    %c0_0 = arith.constant 0 : index
    %0 = vector.load %arg0[%c0, %c0_0] : memref<2x256xf32, #tpu.memory_space<vmem>>, vector<2x256xf32>
    %c0_1 = arith.constant 0 : index
    %c0_2 = arith.constant 0 : index
    %1 = vector.load %arg1[%c0_1, %c0_2] : memref<8x128xf32, #tpu.memory_space<vmem>>, vector<8x128xf32>
    %2 = vector.extract_strided_slice %1 {offsets = [0, 0], sizes = [8, 1], strides = [1, 1]} : vector<8x128xf32> to vector<8x1xf32>
    %3 = vector.extract_strided_slice %1 {offsets = [0, 1], sizes = [8, 1], strides = [1, 1]} : vector<8x128xf32> to vector<8x1xf32>
    %4 = vector.extract_strided_slice %1 {offsets = [0, 2], sizes = [8, 1], strides = [1, 1]} : vector<8x128xf32> to vector<8x1xf32>
    %5 = vector.extract_strided_slice %1 {offsets = [0, 3], sizes = [8, 1], strides = [1, 1]} : vector<8x128xf32> to vector<8x1xf32>
    %6 = vector.extract_strided_slice %1 {offsets = [0, 4], sizes = [8, 1], strides = [1, 1]} : vector<8x128xf32> to vector<8x1xf32>
    %7 = vector.extract_strided_slice %1 {offsets = [0, 5], sizes = [8, 1], strides = [1, 1]} : vector<8x128xf32> to vector<8x1xf32>
    %8 = vector.extract_strided_slice %1 {offsets = [0, 6], sizes = [2, 1], strides = [1, 1]} : vector<8x128xf32> to vector<2x1xf32>
    %9 = vector.extract_strided_slice %1 {offsets = [0, 7], sizes = [2, 1], strides = [1, 1]} : vector<8x128xf32> to vector<2x1xf32>
    %10 = vector.extract_strided_slice %1 {offsets = [0, 8], sizes = [2, 1], strides = [1, 1]} : vector<8x128xf32> to vector<2x1xf32>
    %11 = vector.extract_strided_slice %0 {offsets = [0, 0], sizes = [1, 256], strides = [1, 1]} : vector<2x256xf32> to vector<1x256xf32>
    %12 = vector.broadcast %2 : vector<8x1xf32> to vector<8x256xf32>
    %13 = vector.broadcast %11 : vector<1x256xf32> to vector<8x256xf32>
    %14 = arith.mulf %12, %13 : vector<8x256xf32>
    %15 = vector.extract_strided_slice %0 {offsets = [1, 0], sizes = [1, 256], strides = [1, 1]} : vector<2x256xf32> to vector<1x256xf32>
    %16 = vector.broadcast %3 : vector<8x1xf32> to vector<8x256xf32>
    %17 = vector.broadcast %15 : vector<1x256xf32> to vector<8x256xf32>
    %18 = arith.mulf %16, %17 : vector<8x256xf32>
    %19 = arith.addf %14, %18 : vector<8x256xf32>
    %20 = vector.broadcast %4 : vector<8x1xf32> to vector<8x256xf32>
    %21 = arith.addf %19, %20 : vector<8x256xf32>
    %cst = arith.constant dense<0.000000e+00> : vector<8xf32>
    %22 = vector.multi_reduction <add>, %21, %cst [1] : vector<8x256xf32> to vector<8xf32>
    %23 = vector.shape_cast %22 : vector<8xf32> to vector<8x1xf32>
    %cst_3 = arith.constant 2.560000e+02 : f32
    %24 = vector.broadcast %cst_3 : f32 to vector<8x1xf32>
    %25 = arith.divf %23, %24 : vector<8x1xf32>
    %26 = vector.broadcast %25 : vector<8x1xf32> to vector<8x256xf32>
    %27 = arith.subf %21, %26 : vector<8x256xf32>
    %28 = vector.broadcast %25 : vector<8x1xf32> to vector<8x256xf32>
    %29 = arith.subf %21, %28 : vector<8x256xf32>
    %30 = arith.mulf %27, %29 : vector<8x256xf32>
    %cst_4 = arith.constant dense<0.000000e+00> : vector<8xf32>
    %31 = vector.multi_reduction <add>, %30, %cst_4 [1] : vector<8x256xf32> to vector<8xf32>
    %32 = vector.shape_cast %31 : vector<8xf32> to vector<8x1xf32>
    %cst_5 = arith.constant 2.560000e+02 : f32
    %33 = vector.broadcast %cst_5 : f32 to vector<8x1xf32>
    %34 = arith.divf %32, %33 : vector<8x1xf32>
    %cst_6 = arith.constant 9.99999974E-6 : f32
    %35 = vector.broadcast %cst_6 : f32 to vector<8x1xf32>
    %36 = arith.addf %34, %35 : vector<8x1xf32>
    %37 = math.rsqrt %36 : vector<8x1xf32>
    %38 = arith.mulf %5, %37 : vector<8x1xf32>
    %39 = vector.broadcast %38 : vector<8x1xf32> to vector<8x256xf32>
    %40 = arith.mulf %21, %39 : vector<8x256xf32>
    %41 = arith.mulf %25, %38 : vector<8x1xf32>
    %42 = arith.subf %6, %41 : vector<8x1xf32>
    %43 = vector.broadcast %42 : vector<8x1xf32> to vector<8x256xf32>
    %44 = arith.addf %40, %43 : vector<8x256xf32>
    %45 = tpu.iota {dimensions = array<i32: 0>} : vector<8x256xi32>
    %c4_i32 = arith.constant 4 : i32
    %46 = vector.broadcast %c4_i32 : i32 to vector<8x256xi32>
    %47 = arith.cmpi slt, %45, %46 : vector<8x256xi32>
    %cst_7 = arith.constant 0.000000e+00 : f32
    %48 = vector.broadcast %cst_7 : f32 to vector<8x256xf32>
    %49 = arith.maximumf %44, %48 : vector<8x256xf32>
    %50 = arith.select %47, %49, %44 : vector<8x256xi1>, vector<8x256xf32>
    %51 = vector.broadcast %7 : vector<8x1xf32> to vector<8x256xf32>
    %52 = arith.mulf %50, %51 : vector<8x256xf32>
    %53 = vector.extract_strided_slice %52 {offsets = [0, 0], sizes = [4, 256], strides = [1, 1]} : vector<8x256xf32> to vector<4x256xf32>
    %cst_8 = arith.constant dense<0.000000e+00> : vector<256xf32>
    %54 = vector.multi_reduction <add>, %53, %cst_8 [0] : vector<4x256xf32> to vector<256xf32>
    %55 = vector.shape_cast %54 : vector<256xf32> to vector<1x256xf32>
    %56 = vector.extract_strided_slice %52 {offsets = [4, 0], sizes = [4, 256], strides = [1, 1]} : vector<8x256xf32> to vector<4x256xf32>
    %cst_9 = arith.constant dense<0.000000e+00> : vector<256xf32>
    %57 = vector.multi_reduction <add>, %56, %cst_9 [0] : vector<4x256xf32> to vector<256xf32>
    %58 = vector.shape_cast %57 : vector<256xf32> to vector<1x256xf32>
    %59 = tpu.concatenate %55, %58 in 0 : vector<1x256xf32>, vector<1x256xf32> -> vector<2x256xf32>
    %60 = vector.broadcast %8 : vector<2x1xf32> to vector<2x256xf32>
    %61 = arith.addf %59, %60 : vector<2x256xf32>
    %cst_10 = arith.constant dense<0.000000e+00> : vector<2xf32>
    %62 = vector.multi_reduction <add>, %61, %cst_10 [1] : vector<2x256xf32> to vector<2xf32>
    %63 = vector.shape_cast %62 : vector<2xf32> to vector<2x1xf32>
    %cst_11 = arith.constant 2.560000e+02 : f32
    %64 = vector.broadcast %cst_11 : f32 to vector<2x1xf32>
    %65 = arith.divf %63, %64 : vector<2x1xf32>
    %66 = vector.broadcast %65 : vector<2x1xf32> to vector<2x256xf32>
    %67 = arith.subf %61, %66 : vector<2x256xf32>
    %68 = vector.broadcast %65 : vector<2x1xf32> to vector<2x256xf32>
    %69 = arith.subf %61, %68 : vector<2x256xf32>
    %70 = arith.mulf %67, %69 : vector<2x256xf32>
    %cst_12 = arith.constant dense<0.000000e+00> : vector<2xf32>
    %71 = vector.multi_reduction <add>, %70, %cst_12 [1] : vector<2x256xf32> to vector<2xf32>
    %72 = vector.shape_cast %71 : vector<2xf32> to vector<2x1xf32>
    %cst_13 = arith.constant 2.560000e+02 : f32
    %73 = vector.broadcast %cst_13 : f32 to vector<2x1xf32>
    %74 = arith.divf %72, %73 : vector<2x1xf32>
    %cst_14 = arith.constant 9.99999974E-6 : f32
    %75 = vector.broadcast %cst_14 : f32 to vector<2x1xf32>
    %76 = arith.addf %74, %75 : vector<2x1xf32>
    %77 = math.rsqrt %76 : vector<2x1xf32>
    %78 = arith.mulf %9, %77 : vector<2x1xf32>
    %79 = vector.broadcast %78 : vector<2x1xf32> to vector<2x256xf32>
    %80 = arith.mulf %61, %79 : vector<2x256xf32>
    %81 = arith.mulf %65, %78 : vector<2x1xf32>
    %82 = arith.subf %10, %81 : vector<2x1xf32>
    %83 = vector.broadcast %82 : vector<2x1xf32> to vector<2x256xf32>
    %84 = arith.addf %80, %83 : vector<2x256xf32>
    %c0_15 = arith.constant 0 : index
    %c0_16 = arith.constant 0 : index
    %85 = vector.load %arg2[%c0_15, %c0_16] : memref<9x256xf32, #tpu.memory_space<vmem>>, vector<9x256xf32>
    %cst_17 = arith.constant dense<0.000000e+00> : vector<2x9xf32>
    %86 = tpu.matmul %84, %85, %cst_17 {dimension_numbers = #tpu.dot_dimension_numbers<[1], [1], [0], [0], [0, 0, 1, 0], [], []>} : vector<2x256xf32>, vector<9x256xf32>, vector<2x9xf32> -> vector<2x9xf32>
    %c0_18 = arith.constant 0 : index
    %c0_19 = arith.constant 0 : index
    %87 = vector.load %arg3[%c0_18, %c0_19] : memref<1x9xf32, #tpu.memory_space<vmem>>, vector<1x9xf32>
    %88 = vector.broadcast %87 : vector<1x9xf32> to vector<2x9xf32>
    %89 = arith.addf %86, %88 : vector<2x9xf32>
    %90 = vector.extract_strided_slice %89 {offsets = [0, 0], sizes = [1, 8], strides = [1, 1]} : vector<2x9xf32> to vector<1x8xf32>
    %cst_20 = arith.constant dense<0xFF800000> : vector<1xf32>
    %91 = vector.multi_reduction <maximumf>, %90, %cst_20 [1] : vector<1x8xf32> to vector<1xf32>
    %92 = vector.shape_cast %91 : vector<1xf32> to vector<1x1xf32>
    %93 = vector.broadcast %92 : vector<1x1xf32> to vector<1x8xf32>
    %94 = arith.subf %90, %93 : vector<1x8xf32>
    %95 = math.exp %94 : vector<1x8xf32>
    %cst_21 = arith.constant dense<0.000000e+00> : vector<1xf32>
    %96 = vector.multi_reduction <add>, %95, %cst_21 [1] : vector<1x8xf32> to vector<1xf32>
    %97 = vector.shape_cast %96 : vector<1xf32> to vector<1x1xf32>
    %98 = vector.broadcast %97 : vector<1x1xf32> to vector<1x8xf32>
    %99 = arith.divf %95, %98 : vector<1x8xf32>
    %100 = vector.extract_strided_slice %89 {offsets = [1, 8], sizes = [1, 1], strides = [1, 1]} : vector<2x9xf32> to vector<1x1xf32>
    %101 = math.tanh %100 : vector<1x1xf32>
    %102 = tpu.concatenate %99, %101 in 1 : vector<1x8xf32>, vector<1x1xf32> -> vector<1x9xf32>
    %c0_22 = arith.constant 0 : index
    %c0_23 = arith.constant 0 : index
    %103 = vector.load %arg4[%c0_22, %c0_23] : memref<1x9xf32, #tpu.memory_space<vmem>>, vector<1x9xf32>
    tpu.vector_store %arg4[%c0_22, %c0_23], %102 {strides = array<i32>} : memref<1x9xf32, #tpu.memory_space<vmem>>, vector<1x9xf32>,
    return
  }
}

</mosaic_0001>

<bundles_post_ra>
// kernel: prediction_function.1
= control target key start
LH: loop header
LB: loop body
LE: loop exit
PB: predicated region body
PF: predicated region fallthrough
CT: control target
= control target key end

     0   :  { %v350_v0 = vmov 0   ;;  %v351_v2 = vmov 2   ;;  %v352_v3 = vmov 1   ;;  %v25_v4 = vlaneseq  ;;  %s429_s1 = inlined_call_operand.vmem [shape: f32[8,128], index: 1, kind: input, shape index: {}]   ;;  %s430_s0 = inlined_call_operand.vmem [shape: f32[2,256], index: 0, kind: input, shape index: {}]   ;;  %s431_s2 = inlined_call_operand.vmem [shape: f32[9,256], index: 2, kind: input, shape index: {}]   ;;  %s432_s3 = inlined_call_operand.vmem [shape: f32[1,9], index: 3, kind: input, shape index: {}]   ;;  %s433_s4 = inlined_call_operand.vmem [shape: f32[1,9], index: 4, kind: output, shape index: {}]  }
   0x1   :  { %330 = vset.pattern.permute.xlu0 %v350_v0  ;;  %v388_v1 = vld [vmem:[%s429_s1] sm:$0xff]  ;;  %332 = vset.pattern.permute.xlu1 %v351_v2  ;;  %v353_v38 = vmov 3   ;;  %v354_v42 = vmov 4   ;;  %v356_v48 = vmov 5   ;;  %v357_v49 = vmov 6  }
   0x2   :  { %21 = vperm.xlu0 %330, %v388_v1   ;;  %72 = vperm.xlu1 %332, %v388_v1   ;;  %v393_v5 = vshrl.u32 %v25_v4, 7  ;;  %v17_v10 = vld [vmem:[%s430_s0] sm:$0xf]  ;;  %s355_s0 = smov 1   ;;  %vm126_vm1 = vcmask 1043456   ;;  %vm161_vm2 = vcmask 1040384  }
   0x3   :  { %vm170_vm3 = vcmask 1041408   ;;  %vm291_vm4 = vcmask 57344   ;;  %vm307_vm5 = vcmask 64512   ;;  %vm309_vm6 = vcmask 65536  }
   0x4   :  { %v27_v6 = vsub.s32 0, %v393_v5  ;;  %v31_v7 = vsub.s32 2, %v393_v5  ;;  %v51_v8 = vsub.s32 1, %v393_v5  ;;  %v55_v9 = vsub.s32 3, %v393_v5 }
   0x5   :  { %vm115_vm0 = vcmp.lt.s32.totalorder %v393_v5, 4 }
   0x6   :  { %331 = vset.pattern.permute.xlu0 %v352_v3  ;;  %v28_v11 = vrot.slane %v17_v10, %v27_v6  ;;  %v32_v12 = vrot.slane %v17_v10, %v31_v7  ;;  %v52_v13 = vrot.slane %v17_v10, %v51_v8  ;;  %v56_v14 = vrot.slane %v17_v10, %v55_v9 }
   0x7   :  { %46 = vperm.xlu0 %331, %v388_v1   ;;  %334 = vset.pattern.permute.xlu1 %v354_v42 }
   0x8   :  { %v38_v16 = vrot.slane %v28_v11, %v27_v6  ;;  %v42_v17 = vrot.slane %v32_v12, %v27_v6  ;;  %v62_v18 = vrot.slane %v52_v13, %v51_v8  ;;  %v66_v19 = vrot.slane %v56_v14, %v51_v8 }
   0xb   :  { %333 = vset.pattern.permute.xlu0 %v353_v38 }
  0x81   :  { %v22_v15 = vpop.permute.xlu0 %21  ;;  %v73_v25 = vpop.permute.xlu1 %72 }
  0x82   :  { %v43_v21 = vmul.f32 %v38_v16, %v22_v15  ;;  %v44_v22 = vmul.f32 %v42_v17, %v22_v15 }
  0x86   :  { %v47_v20 = vpop.permute.xlu0 %46 }
  0x87   :  { %v67_v23 = vmul.f32 %v62_v18, %v47_v20  ;;  %v68_v24 = vmul.f32 %v66_v19, %v47_v20 }
  0x89   :  { %v69_v26 = vadd.f32 %v67_v23, %v43_v21  ;;  %v70_v27 = vadd.f32 %v68_v24, %v44_v22 }
  0x8b   :  { %v75_v28 = vadd.f32 %v73_v25, %v69_v26  ;;  %v76_v29 = vadd.f32 %v73_v25, %v70_v27 }
  0x8d   :  { %v77_v30 = vadd.f32 %v76_v29, %v75_v28 }
  0x8f   :  { %78 = vadd.xlane.f32.xlu1 %v77_v30 }
 0x11c   :  { %v79_v31 = vpop.xlane.xlu1 %78 }
 0x11d   :  { %v81_v32 = vmul.f32 0.00390625, %v79_v31 }
 0x11f   :  { %v82_v33 = vsub.f32 %v75_v28, %v81_v32  ;;  %v83_v34 = vsub.f32 %v76_v29, %v81_v32 }
 0x121   :  { %v84_v35 = vmul.f32 %v82_v33, %v82_v33  ;;  %v85_v36 = vmul.f32 %v83_v34, %v83_v34 }
 0x123   :  { %v86_v37 = vadd.f32 %v85_v36, %v84_v35 }
 0x125   :  { %87 = vadd.xlane.f32.xlu0 %v86_v37 }
 0x1b2   :  { %v88_v39 = vpop.xlane.xlu0 %87 }
 0x1b3   :  { %v89_v40 = vmul.f32 0.00390625, %v88_v39 }
 0x1b5   :  { %v90_v41 = vadd.f32 1e-05, %v89_v40 }
 0x1b7   :  { %340 = vrsqrt.f32 %v90_v41 }
 0x1c1   :  { %v341_v43 = vpop.eup %340 }
 0x1c2   :  { %v92_v44 = vmul.f32 %v341_v43, %v388_v1 }
 0x1c4   :  { %95 = vperm.xlu0 %333, %v92_v44   ;;  %v100_v45 = vmul.f32 %v92_v44, %v81_v32 }
 0x1c6   :  { %102 = vrot.lane.b32.xlu1 %v100_v45, %s355_s0 }
 0x238   :  { %v103_v46 = vpop.permute.xlu1 %102 }
 0x239   :  { %v105_v47 = vsub.f32 %v388_v1, %v103_v46 }
 0x23b   :  { %108 = vperm.xlu1 %334, %v105_v47   ;;  %v358_v47 = vmov 7  }
 0x23c   :  { %337 = vset.pattern.permute.xlu0 %v358_v47 }
 0x23f   :  { %335 = vset.pattern.permute.xlu1 %v356_v48 }
 0x240   :  { %121 = vperm.xlu1 %335, %v388_v1  }
 0x243   :  { %v96_v50 = vpop.permute.xlu0 %95 }
 0x244   :  { %336 = vset.pattern.permute.xlu1 %v357_v49  ;;  %v98_v51 = vmul.f32 %v96_v50, %v75_v28  ;;  %v99_v52 = vmul.f32 %v96_v50, %v76_v29 }
 0x245   :  { %165 = vperm.xlu1 %336, %v388_v1  }
 0x2ba   :  { %v109_v53 = vpop.permute.xlu1 %108 }
 0x2bb   :  { %v111_v54 = vadd.f32 %v109_v53, %v98_v51  ;;  %v112_v55 = vadd.f32 %v109_v53, %v99_v52  ;;  %v359_v51 = vmov 8  }
 0x2bc   :  { %338 = vset.pattern.permute.xlu1 %v359_v51 }
 0x2bd   :  { %v116_v56 = vmax.f32 %v111_v54, 0.0  ;;  %v117_v57 = vmax.f32 %v112_v55, 0.0 }
 0x2bf   :  { %v118_v58 = vsel %vm115_vm0, %v116_v56, %v111_v54  ;;  %v119_v59 = vsel %vm115_vm0, %v117_v57, %v112_v55  ;;  %v122_v60 = vpop.permute.xlu1 %121  ;;  %v211_v55 = vld [vmem:[%s431_s2 + $0x8] sm:$0xff]  ;;  %v213_v56 = vld [vmem:[%s431_s2 + $0x18] sm:$0x1]  ;;  %v210_v57 = vld [vmem:[%s431_s2] sm:$0xff] }
 0x2c0   :  { %v124_v61 = vmul.f32 %v122_v60, %v118_v58  ;;  %v125_v62 = vmul.f32 %v122_v60, %v119_v59  ;;  %v316_v58 = vpack.c.bf16 %v213_v56, %v211_v55  ;;  %v212_v59 = vld [vmem:[%s431_s2 + $0x10] sm:$0x1] }
 0x2c1   :  { %v318_v60 = vpack.c.bf16 %v212_v59, %v210_v57 }
 0x2c2   :  { %v127_v63 = vsel %vm126_vm1, %v124_v61, 0.0  ;;  %v134_v0 = vsel %vm126_vm1, %v125_v62, 0.0  ;;  %v143_v2 = vrot.slane %v124_v61, 4  ;;  %v144_v3 = vrot.slane %v125_v62, 4  ;;  %317 = vmatprep.subr.bf16.mxu0 %v316_v58 }
 0x2c3   :  { %v128_v4 = vrot.slane %v127_v63, 4  ;;  %v135_v6 = vrot.slane %v134_v0, 4  ;;  %319 = vmatpush1.bf16.xpose.msra.mxu0 %v318_v60 }
 0x2c4   :  { %v147_v7 = vsel %vm126_vm1, %v143_v2, 0.0  ;;  %v154_v8 = vsel %vm126_vm1, %v144_v3, 0.0  ;;  %v166_v30 = vpop.permute.xlu1 %165 }
 0x2c5   :  { %v129_v9 = vadd.f32 %v128_v4, %v127_v63  ;;  %v136_v10 = vadd.f32 %v135_v6, %v134_v0  ;;  %v148_v11 = vrot.slane %v147_v7, 4  ;;  %v155_v5 = vrot.slane %v154_v8, 4 }
 0x2c7   :  { %v130_v12 = vrot.slane %v129_v9, 2  ;;  %v137_v13 = vrot.slane %v136_v10, 2  ;;  %v149_v14 = vadd.f32 %v148_v11, %v147_v7  ;;  %v156_v15 = vadd.f32 %v155_v5, %v154_v8  ;;  %v315_v7 = vld [vmem:[%s432_s3] ss:$0 sm:$0xff] }
 0x2c9   :  { %v131_v16 = vadd.f32 %v130_v12, %v129_v9  ;;  %v138_v17 = vadd.f32 %v137_v13, %v136_v10  ;;  %v150_v18 = vrot.slane %v149_v14, 2  ;;  %v157_v19 = vrot.slane %v156_v15, 2 }
 0x2cb   :  { %v132_v20 = vrot.slane %v131_v16, 1  ;;  %v139_v21 = vrot.slane %v138_v17, 1  ;;  %v151_v22 = vadd.f32 %v150_v18, %v149_v14  ;;  %v158_v23 = vadd.f32 %v157_v19, %v156_v15 }
 0x2cd   :  { %v152_v24 = vrot.slane %v151_v22, 1  ;;  %v159_v25 = vrot.slane %v158_v23, 1  ;;  %v133_v26 = vadd.f32 %v132_v20, %v131_v16  ;;  %v140_v27 = vadd.f32 %v139_v21, %v138_v17 }
 0x2cf   :  { %v153_v28 = vadd.f32 %v152_v24, %v151_v22  ;;  %v160_v29 = vadd.f32 %v159_v25, %v158_v23 }
 0x2d1   :  { %v162_v31 = vsel %vm161_vm2, %v133_v26, %v153_v28  ;;  %v163_v32 = vsel %vm161_vm2, %v140_v27, %v160_v29 }
 0x2d2   :  { %v168_v33 = vadd.f32 %v166_v30, %v162_v31  ;;  %v169_v34 = vadd.f32 %v166_v30, %v163_v32 }
 0x2d4   :  { %v171_v35 = vsel %vm170_vm3, %v168_v33, 0.0  ;;  %v172_v36 = vsel %vm170_vm3, %v169_v34, 0.0 }
 0x2d5   :  { %v173_v37 = vadd.f32 %v172_v36, %v171_v35 }
 0x2d7   :  { %174 = vadd.xlane.f32.xlu1 %v173_v37 }
 0x364   :  { %v175_v38 = vpop.xlane.xlu1 %174 }
 0x365   :  { %v176_v39 = vmul.f32 0.00390625, %v175_v38 }
 0x367   :  { %v177_v40 = vsub.f32 %v168_v33, %v176_v39  ;;  %v178_v41 = vsub.f32 %v169_v34, %v176_v39 }
 0x369   :  { %v179_v42 = vmul.f32 %v177_v40, %v177_v40  ;;  %v180_v43 = vmul.f32 %v178_v41, %v178_v41 }
 0x36b   :  { %v181_v44 = vsel %vm170_vm3, %v179_v42, 0.0  ;;  %v182_v45 = vsel %vm170_vm3, %v180_v43, 0.0 }
 0x36c   :  { %v183_v46 = vadd.f32 %v182_v45, %v181_v44 }
 0x36e   :  { %184 = vadd.xlane.f32.xlu0 %v183_v46 }
 0x3fb   :  { %v185_v48 = vpop.xlane.xlu0 %184 }
 0x3fc   :  { %v186_v49 = vmul.f32 0.00390625, %v185_v48 }
 0x3fe   :  { %v187_v50 = vadd.f32 1e-05, %v186_v49 }
 0x400   :  { %342 = vrsqrt.f32 %v187_v50 }
 0x40a   :  { %v343_v52 = vpop.eup %342 }
 0x40b   :  { %v189_v53 = vmul.f32 %v343_v52, %v388_v1 }
 0x40d   :  { %192 = vperm.xlu0 %337, %v189_v53   ;;  %v197_v54 = vmul.f32 %v189_v53, %v176_v39 }
 0x40f   :  { %199 = vrot.lane.b32.xlu1 %v197_v54, %s355_s0 }
 0x411   :  { %339 = vset.pattern.permute.xlu0 %v359_v51 }
 0x481   :  { %v200_v61 = vpop.permute.xlu1 %199 }
 0x482   :  { %v202_v62 = vsub.f32 %v388_v1, %v200_v61 }
 0x484   :  { %205 = vperm.xlu1 %338, %v202_v62  }
 0x48c   :  { %v193_v63 = vpop.permute.xlu0 %192 }
 0x48d   :  { %v195_v0 = vmul.f32 %v193_v63, %v168_v33  ;;  %v196_v2 = vmul.f32 %v193_v63, %v169_v34 }
 0x503   :  { %v206_v3 = vpop.permute.xlu1 %205 }
 0x504   :  { %v208_v4 = vadd.f32 %v206_v3, %v195_v0  ;;  %v209_v6 = vadd.f32 %v206_v3, %v196_v2 }
 0x506   :  { %285 = vmatprep.mubr.f32.mxu0 %v209_v6 }
 0x507   :  { %286 = vmatmul.mubr.f32.vlgmr.msra.gmra.mrb[0].mxu0 %v208_v4 }
 0x5da   :  { %v287_v8 = vpop.f32.mrb[0].mxu0 }
 0x5db   :  { %v288_v9 = vadd.f32 %v315_v7, %v287_v8  ;;  %v289_v10 = vpop.f32.mrb[1].mxu0 }
 0x5dd   :  { %v292_v11 = vsel %vm291_vm4, %v288_v9, -inf }
 0x5de   :  { %293 = vmax.xlane.f32.xlu1 %v292_v11 }
 0x66b   :  { %v294_v1 = vpop.xlane.xlu1 %293 }
 0x66c   :  { %v295_v5 = vsub.f32 %v288_v9, %v294_v1 }
 0x66e   :  { %v296_v12 = vmul.f32 1.442695, %v295_v5 }
 0x670   :  { %344 = vpow2.f32 %v296_v12 }
 0x671   :  { %346 = vtanh.f32 %v288_v9 }
 0x67a   :  { %v345_v13 = vpop.eup %344 }
 0x67b   :  { %v298_v14 = vsel %vm291_vm4, %v345_v13, 0.0  ;;  %v347_v16 = vpop.eup %346 }
 0x67c   :  { %299 = vadd.xlane.f32.xlu0 %v298_v14  ;;  %v305_v18 = vrot.slane %v347_v16, 1 }
 0x709   :  { %v300_v15 = vpop.xlane.xlu0 %299 }
 0x70a   :  { %348 = vrcp.f32 %v300_v15 }
 0x714   :  { %v349_v17 = vpop.eup %348 }
 0x715   :  { %v302_v19 = vmul.f32 %v349_v17, %v345_v13 }
 0x717   :  { %v308_v20 = vsel %vm307_vm5, %v302_v19, %v305_v18 }
 0x718   :  { %310 = vst.msk [vmem:[%s433_s4] sm:$0x1] %vm309_vm6, %v308_v20 }

</bundles_post_ra>
